<compile_context>
chip_gen: v6e
topology: v6e:2x2x1
jax: 0.10.0
libtpu: 0.0.40
codegen_flags: <defaults>
</compile_context>

<pallas_src>
import functools
import math

import numpy as np
import jax
import jax.numpy as jnp
from jax.experimental import pallas as pl
from jax.experimental.pallas import tpu as pltpu


# ---------------------------------------------------------------------------
# Host-side glue: replicate the FFT-period -> key-index construction loop
# (this is exactly the python loop inside _periorprob_QK, minus torch.load).
# ---------------------------------------------------------------------------
def _build_period_indices(output_fft, L_K):
    index_K = []
    for m in range(output_fft.shape[0]):
        P = output_fft[m, :, 1]
        Amp = output_fft[m, :, 0]
        P_eli, Amp_eli, index_P = [], [], []
        for i in range(len(P)):
            if P[i] <= L_K:
                index_P.append(i)
        for i in index_P:
            P_eli.append(P[i])
            Amp_eli.append(Amp[i])
        index_K = []          # reset per m, as in the original code
        for j in range(len(Amp_eli)):
            for i in range(math.ceil(L_K / P_eli[j])):
                if L_K - (i + 1) * P_eli[j] >= 0:
                    index_K.append(int(L_K - (i + 1) * P_eli[j]))
    return index_K


def _vmem_limit_bytes(per_step_bytes):
    # double-buffered pipeline blocks + headroom; clamp to stay inside the
    # smallest per-core VMEM across generations (v7x: 64 MiB physical,
    # v5e default scoped limit is only 16 MiB so raise it explicitly).
    need = int(per_step_bytes) * 2 * 2
    return int(min(max(need, 16 * 1024 * 1024), 64 * 1024 * 1024))


# ---------------------------------------------------------------------------
# Kernel 1: sparsity-measurement scores
#   M[b, h, q] = max_s(Q_h[q] . K_h_s^2) - sum_s(Q_h[q] . K_h_s^2) / L_K
# layout: (B, L, H*D) input blocks, (B, H, L) lane-dense output.
# ---------------------------------------------------------------------------
def _m_kernel(q_ref, ks_ref, m_ref, *, n_heads, d_head, inv_l_k):
    # q_ref: (L, H*D) f32, ks_ref: (S, H*D) f32, m_ref: (H, L) f32
    for h in range(n_heads):
        sl = slice(h * d_head, (h + 1) * d_head)
        q_h = q_ref[:, sl]                            # (L, D)
        ks_h = ks_ref[:, sl]                          # (S, D) sampled keys
        ks2 = ks_h * ks_h                             # K_sample * K_sample (f32)
        # (S, L) orientation: the sample axis sits on sublanes, so the
        # reduction result lands lane-major and the store is full-lane-width.
        st = jax.lax.dot_general(ks2, q_h, (((1,), (1,)), ((), ())),
                                 preferred_element_type=jnp.float32)   # (S, L)
        m_ref[h:h + 1, :] = (jnp.max(st, axis=0, keepdims=True)
                             - jnp.sum(st, axis=0, keepdims=True) * inv_l_k)


def _m_scores(q, k_samp, l_k, n_heads, d_head):
    B, L, HD = q.shape
    S = k_samp.shape[1]
    per_step = (L * HD + S * HD + n_heads * L) * 4
    return pl.pallas_call(
        functools.partial(_m_kernel, n_heads=n_heads, d_head=d_head,
                          inv_l_k=1.0 / float(l_k)),
        out_shape=jax.ShapeDtypeStruct((B, n_heads, L), jnp.float32),
        grid=(B,),
        in_specs=[pl.BlockSpec((None, L, HD), lambda b: (b, 0, 0)),
                  pl.BlockSpec((None, S, HD), lambda b: (b, 0, 0))],
        out_specs=pl.BlockSpec((None, n_heads, L), lambda b: (b, 0, 0)),
        compiler_params=pltpu.CompilerParams(
            dimension_semantics=("parallel",),
            vmem_limit_bytes=_vmem_limit_bytes(per_step)),
    )(q, k_samp)


# ---------------------------------------------------------------------------
# Kernel 2: cumsum initial context + sparse (top-u) causal attention + scatter
# ---------------------------------------------------------------------------
def _ctx_kernel(mt_ref, tri_ref, q_ref, k_ref, v_ref, idx_ref, o_ref, qred_ref,
                *, n_heads, d_head, n_top, scale):
    # mt_ref  : SMEM (B*H*u,) int32  scalar-prefetched top-k row indices
    # tri_ref : VMEM (L, L)   bf16   lower-triangular ones (constant, resident)
    # q/k/v   : VMEM (L, H*D) f32
    # idx_ref : VMEM (u, H)   int32  same indices, for the causal ProbMask
    # o_ref   : VMEM (L, H*D) f32
    # qred_ref: VMEM (u, D)   f32    scratch used to assemble Q_reduce
    b = pl.program_id(0)
    L = v_ref.shape[0]

    v_bf = v_ref[...].astype(jnp.bfloat16)            # (L, H*D)
    k_bf = k_ref[...].astype(jnp.bfloat16)            # (L, H*D)

    # initial context = V.cumsum(dim=-2) for all heads at once, as a single
    # lane-dense MXU matmul against the resident triangular operand.
    o_ref[...] = jnp.dot(tri_ref[...], v_bf, preferred_element_type=jnp.float32)

    lane = jax.lax.broadcasted_iota(jnp.int32, (n_top, L), 1)      # (u, L)

    for h in range(n_heads):
        sl = slice(h * d_head, (h + 1) * d_head)
        base = (b * n_heads + h) * n_top

        # gather the top-u query rows (dynamic row loads driven by SMEM scalars)
        rows = []
        for j in range(n_top):
            r = mt_ref[base + j]
            rows.append(r)
            qred_ref[j:j + 1, :] = q_ref[pl.ds(r, 1), sl]
        q_red = qred_ref[...].astype(jnp.bfloat16)                 # (u, D)

        # scores = scale * Q_reduce @ K_h^T  (bf16 operands, f32 accumulate)
        scores = jax.lax.dot_general(q_red, k_bf[:, sl],
                                     (((1,), (1,)), ((), ())),
                                     preferred_element_type=jnp.float32) * scale
        # ProbMask: mask keys strictly beyond each selected query's position.
        idx_col = idx_ref[:, h:h + 1]                              # (u, 1)
        scores = jnp.where(lane > idx_col, jnp.float32(-1e30), scores)

        # softmax in f32; divide moved to the EUP reciprocal slot.
        mx = jnp.max(scores, axis=-1, keepdims=True)
        e = jnp.exp(scores - mx)
        attn = e * pl.reciprocal(jnp.sum(e, axis=-1, keepdims=True), approx=True)

        out = jnp.dot(attn.astype(jnp.bfloat16), v_bf[:, sl],
                      preferred_element_type=jnp.float32)          # (u, D)

        # scatter the u updated rows back over the cumsum context.
        for j in range(n_top):
            o_ref[pl.ds(rows[j], 1), sl] = out[j:j + 1, :]


def _sparse_context(q, k, v, tri, m_top, scale, n_heads, d_head):
    B, L, HD = q.shape
    u = m_top.shape[-1]
    mt_flat = m_top.reshape(-1).astype(jnp.int32)                    # -> SMEM
    idx_cols = jnp.transpose(m_top, (0, 2, 1)).astype(jnp.int32)     # (B, u, H)
    per_step = (L * L * 2                       # resident bf16 triangular input
                + 4 * L * HD * 4                # q, k, v, out blocks (f32)
                + u * n_heads * 4 + u * d_head * 4)
    grid_spec = pltpu.PrefetchScalarGridSpec(
        num_scalar_prefetch=1,
        grid=(B,),
        in_specs=[pl.BlockSpec((L, L), lambda b, mt: (0, 0)),
                  pl.BlockSpec((None, L, HD), lambda b, mt: (b, 0, 0)),
                  pl.BlockSpec((None, L, HD), lambda b, mt: (b, 0, 0)),
                  pl.BlockSpec((None, L, HD), lambda b, mt: (b, 0, 0)),
                  pl.BlockSpec((None, u, n_heads), lambda b, mt: (b, 0, 0))],
        out_specs=pl.BlockSpec((None, L, HD), lambda b, mt: (b, 0, 0)),
        scratch_shapes=[pltpu.VMEM((u, d_head), jnp.float32)])
    return pl.pallas_call(
        functools.partial(_ctx_kernel, n_heads=n_heads, d_head=d_head,
                          n_top=u, scale=float(scale)),
        out_shape=jax.ShapeDtypeStruct((B, L, HD), jnp.float32),
        grid_spec=grid_spec,
        compiler_params=pltpu.CompilerParams(
            dimension_semantics=("parallel",),
            vmem_limit_bytes=_vmem_limit_bytes(per_step)),
    )(mt_flat, tri, q, k, v, idx_cols)


# ---------------------------------------------------------------------------
# Forward wrapper (mask_flag=True, output_attention=False -- the module defaults)
# ---------------------------------------------------------------------------
# TODO(synk): mask_flag=False (mean initial context) and output_attention=True
#             branches are not implemented (module defaults reproduced).
def perior_prob_attention(queries, keys, values, attn_mask=None, *,
                          index_k, factor=5, scale=None):
    B, L_Q, H, D = queries.shape
    L_K = keys.shape[1]
    assert L_Q == L_K                        # mask_flag path asserts L_Q == L_V
    HD = H * D

    # keep the natural (B, L, H*D) layout -- no HBM transposes in or out.
    q = queries.reshape(B, L_Q, HD)
    k = keys.reshape(B, L_K, HD)
    v = values.reshape(B, L_K, HD)

    U_part = min(factor * int(np.ceil(np.log(L_K))), L_K)
    u = min(factor * int(np.ceil(np.log(L_Q))), L_Q)

    idx_k = np.asarray(index_k[:U_part], dtype=np.int32)   # static period indices
    k_samp = k[:, idx_k, :]                  # static gather of sampled key rows

    m = _m_scores(q, k_samp, L_K, H, D)      # (B, H, L)  -- Pallas kernel 1
    _, m_top = jax.lax.top_k(m, u)           # (B, H, u)
    m_top = m_top.astype(jnp.int32)

    scale_v = scale if scale is not None else 1.0 / math.sqrt(D)
    # constant cumsum operator, bf16 (exact 0/1), fetched once per core.
    tri = jnp.asarray(np.tril(np.ones((L_Q, L_Q), np.float32)),
                      dtype=jnp.bfloat16)

    ctx = _sparse_context(q, k, v, tri, m_top, scale_v, H, D)   # (B, L, H*D)
    ctx = ctx.reshape(B, L_Q, H, D)   # == torch's context.transpose(2,1).contiguous()
    return ctx, None


# ---------------------------------------------------------------------------
# Pure-JAX reference (mirrors the PyTorch math) for a correctness check
# ---------------------------------------------------------------------------
def _reference(queries, keys, values, index_k, factor, scale):
    B, L_Q, H, D = queries.shape
    L_K = keys.shape[1]
    q = jnp.transpose(queries, (0, 2, 1, 3))
    k = jnp.transpose(keys, (0, 2, 1, 3))
    v = jnp.transpose(values, (0, 2, 1, 3))
    U_part = min(factor * int(np.ceil(np.log(L_K))), L_K)
    u = min(factor * int(np.ceil(np.log(L_Q))), L_Q)
    idx_k = jnp.asarray(index_k[:U_part], dtype=jnp.int32)
    hi = jax.lax.Precision.HIGHEST
    k_samp = k[:, :, idx_k, :]
    qk_sample = jnp.einsum('bhqe,bhse->bhqs', q, k_samp * k_samp, precision=hi)
    m = jnp.max(qk_sample, -1) - jnp.sum(qk_sample, -1) / L_K
    _, m_top = jax.lax.top_k(m, u)                                    # (B,H,u)
    sc = scale if scale is not None else 1.0 / math.sqrt(D)
    bidx = jnp.arange(B)[:, None, None]
    hidx = jnp.arange(H)[None, :, None]
    q_red = q[bidx, hidx, m_top]                                      # (B,H,u,D)
    scores = jnp.einsum('bhud,bhkd->bhuk', q_red, k, precision=hi) * sc
    mask = jnp.arange(L_K)[None, None, None, :] > m_top[..., None]
    scores = jnp.where(mask, jnp.float32(-1e30), scores)
    attn = jax.nn.softmax(scores, axis=-1)
    ctx = jnp.cumsum(v, axis=2)
    upd = jnp.einsum('bhuk,bhkd->bhud', attn, v, precision=hi)
    ctx = ctx.at[bidx, hidx, m_top].set(upd)
    return jnp.transpose(ctx, (0, 2, 1, 3))


if __name__ == "__main__":
    B, L, H, D = 2, 16, 4, 8
    factor = 5

    key = jax.random.PRNGKey(0)
    kq, kk, kv = jax.random.split(key, 3)
    queries = jax.random.normal(kq, (B, L, H, D), jnp.float32)
    keys = jax.random.normal(kk, (B, L, H, D), jnp.float32)
    values = jax.random.normal(kv, (B, L, H, D), jnp.float32)

    # Deterministic stand-in for torch.load('./outputFFT.pt'):
    # outputFFT[m, f, 0] = amplitude, outputFFT[m, f, 1] = period
    output_fft = np.array([[[1.00, 4.0],
                            [0.80, 3.0],
                            [0.60, 5.0],
                            [0.50, 7.0],
                            [0.40, 6.0],
                            [0.30, 20.0]]], dtype=np.float32)
    index_k = _build_period_indices(output_fft, L)

    ctx, attn = perior_prob_attention(queries, keys, values, None,
                                      index_k=index_k, factor=factor)
    ctx = jax.block_until_ready(ctx)

    assert ctx.shape == (B, L, H, D)
    ref = _reference(queries, keys, values, index_k, factor, None)
    # kernel 2 feeds bf16 operands to the MXU (f32 accumulation), hence the
    # bf16-level tolerance against the f32 reference.
    np.testing.assert_allclose(np.asarray(ctx), np.asarray(ref),
                               atol=4e-2, rtol=4e-2)
    print("KERNEL_OK")
</pallas_src>

<mosaic_0001>
module attributes {stable_mosaic.version = 11 : i64} {
  func.func @_m_kernel(%arg0: i32, %arg1: memref<1x16x32xf32, #tpu.memory_space<vmem>>, %arg2: memref<1x15x32xf32, #tpu.memory_space<vmem>>, %arg3: memref<1x4x16xf32, #tpu.memory_space<vmem>>) attributes {dimension_semantics = [#tpu.dimension_semantics<parallel>], iteration_bounds = array<i64: 2>, scalar_prefetch = 0 : i64, scratch_operands = 0 : i64, tpu.core_type = #tpu.core_type<tc>, window_params = [{transform_indices = @transform_0, window_bounds = array<i64: 1, 16, 32>}, {transform_indices = @transform_1, window_bounds = array<i64: 1, 15, 32>}, {transform_indices = @transform_2, window_bounds = array<i64: 1, 4, 16>}]} {
    %c0 = arith.constant 0 : index
    %c0_0 = arith.constant 0 : index
    %c0_1 = arith.constant 0 : index
    %0 = vector.load %arg1[%c0, %c0_0, %c0_1] : memref<1x16x32xf32, #tpu.memory_space<vmem>>, vector<1x16x8xf32>
    %1 = vector.shape_cast %0 : vector<1x16x8xf32> to vector<16x8xf32>
    %c0_2 = arith.constant 0 : index
    %c0_3 = arith.constant 0 : index
    %c0_4 = arith.constant 0 : index
    %2 = vector.load %arg2[%c0_2, %c0_3, %c0_4] : memref<1x15x32xf32, #tpu.memory_space<vmem>>, vector<1x15x8xf32>
    %3 = vector.shape_cast %2 : vector<1x15x8xf32> to vector<15x8xf32>
    %4 = arith.mulf %3, %3 : vector<15x8xf32>
    %cst = arith.constant dense<0.000000e+00> : vector<15x16xf32>
    %5 = tpu.matmul %4, %1, %cst {dimension_numbers = #tpu.dot_dimension_numbers<[1], [1], [0], [0], [0, 0, 1, 0], [], []>} : vector<15x8xf32>, vector<16x8xf32>, vector<15x16xf32> -> vector<15x16xf32>
    %cst_5 = arith.constant dense<0xFF800000> : vector<16xf32>
    %6 = vector.multi_reduction <maximumf>, %5, %cst_5 [0] : vector<15x16xf32> to vector<16xf32>
    %7 = vector.shape_cast %6 : vector<16xf32> to vector<1x16xf32>
    %cst_6 = arith.constant dense<0.000000e+00> : vector<16xf32>
    %8 = vector.multi_reduction <add>, %5, %cst_6 [0] : vector<15x16xf32> to vector<16xf32>
    %9 = vector.shape_cast %8 : vector<16xf32> to vector<1x16xf32>
    %cst_7 = arith.constant 6.250000e-02 : f32
    %10 = vector.broadcast %cst_7 : f32 to vector<1x16xf32>
    %11 = arith.mulf %9, %10 : vector<1x16xf32>
    %12 = arith.subf %7, %11 : vector<1x16xf32>
    %c0_8 = arith.constant 0 : index
    %c0_9 = arith.constant 0 : index
    %c0_10 = arith.constant 0 : index
    %13 = vector.load %arg3[%c0_8, %c0_9, %c0_10] : memref<1x4x16xf32, #tpu.memory_space<vmem>>, vector<1x1x16xf32>
    %14 = vector.shape_cast %13 : vector<1x1x16xf32> to vector<1x16xf32>
    %15 = vector.shape_cast %12 : vector<1x16xf32> to vector<1x1x16xf32>
    tpu.vector_store %arg3[%c0_8, %c0_9, %c0_10], %15 {strides = array<i32>} : memref<1x4x16xf32, #tpu.memory_space<vmem>>, vector<1x1x16xf32>,
    %c0_11 = arith.constant 0 : index
    %c0_12 = arith.constant 0 : index
    %c8 = arith.constant 8 : index
    %16 = vector.load %arg1[%c0_11, %c0_12, %c8] : memref<1x16x32xf32, #tpu.memory_space<vmem>>, vector<1x16x8xf32>
    %17 = vector.shape_cast %16 : vector<1x16x8xf32> to vector<16x8xf32>
    %c0_13 = arith.constant 0 : index
    %c0_14 = arith.constant 0 : index
    %c8_15 = arith.constant 8 : index
    %18 = vector.load %arg2[%c0_13, %c0_14, %c8_15] : memref<1x15x32xf32, #tpu.memory_space<vmem>>, vector<1x15x8xf32>
    %19 = vector.shape_cast %18 : vector<1x15x8xf32> to vector<15x8xf32>
    %20 = arith.mulf %19, %19 : vector<15x8xf32>
    %cst_16 = arith.constant dense<0.000000e+00> : vector<15x16xf32>
    %21 = tpu.matmul %20, %17, %cst_16 {dimension_numbers = #tpu.dot_dimension_numbers<[1], [1], [0], [0], [0, 0, 1, 0], [], []>} : vector<15x8xf32>, vector<16x8xf32>, vector<15x16xf32> -> vector<15x16xf32>
    %cst_17 = arith.constant dense<0xFF800000> : vector<16xf32>
    %22 = vector.multi_reduction <maximumf>, %21, %cst_17 [0] : vector<15x16xf32> to vector<16xf32>
    %23 = vector.shape_cast %22 : vector<16xf32> to vector<1x16xf32>
    %cst_18 = arith.constant dense<0.000000e+00> : vector<16xf32>
    %24 = vector.multi_reduction <add>, %21, %cst_18 [0] : vector<15x16xf32> to vector<16xf32>
    %25 = vector.shape_cast %24 : vector<16xf32> to vector<1x16xf32>
    %cst_19 = arith.constant 6.250000e-02 : f32
    %26 = vector.broadcast %cst_19 : f32 to vector<1x16xf32>
    %27 = arith.mulf %25, %26 : vector<1x16xf32>
    %28 = arith.subf %23, %27 : vector<1x16xf32>
    %c0_20 = arith.constant 0 : index
    %c1 = arith.constant 1 : index
    %c0_21 = arith.constant 0 : index
    %29 = vector.load %arg3[%c0_20, %c1, %c0_21] : memref<1x4x16xf32, #tpu.memory_space<vmem>>, vector<1x1x16xf32>
    %30 = vector.shape_cast %29 : vector<1x1x16xf32> to vector<1x16xf32>
    %31 = vector.shape_cast %28 : vector<1x16xf32> to vector<1x1x16xf32>
    tpu.vector_store %arg3[%c0_20, %c1, %c0_21], %31 {strides = array<i32>} : memref<1x4x16xf32, #tpu.memory_space<vmem>>, vector<1x1x16xf32>,
    %c0_22 = arith.constant 0 : index
    %c0_23 = arith.constant 0 : index
    %c16 = arith.constant 16 : index
    %32 = vector.load %arg1[%c0_22, %c0_23, %c16] : memref<1x16x32xf32, #tpu.memory_space<vmem>>, vector<1x16x8xf32>
    %33 = vector.shape_cast %32 : vector<1x16x8xf32> to vector<16x8xf32>
    %c0_24 = arith.constant 0 : index
    %c0_25 = arith.constant 0 : index
    %c16_26 = arith.constant 16 : index
    %34 = vector.load %arg2[%c0_24, %c0_25, %c16_26] : memref<1x15x32xf32, #tpu.memory_space<vmem>>, vector<1x15x8xf32>
    %35 = vector.shape_cast %34 : vector<1x15x8xf32> to vector<15x8xf32>
    %36 = arith.mulf %35, %35 : vector<15x8xf32>
    %cst_27 = arith.constant dense<0.000000e+00> : vector<15x16xf32>
    %37 = tpu.matmul %36, %33, %cst_27 {dimension_numbers = #tpu.dot_dimension_numbers<[1], [1], [0], [0], [0, 0, 1, 0], [], []>} : vector<15x8xf32>, vector<16x8xf32>, vector<15x16xf32> -> vector<15x16xf32>
    %cst_28 = arith.constant dense<0xFF800000> : vector<16xf32>
    %38 = vector.multi_reduction <maximumf>, %37, %cst_28 [0] : vector<15x16xf32> to vector<16xf32>
    %39 = vector.shape_cast %38 : vector<16xf32> to vector<1x16xf32>
    %cst_29 = arith.constant dense<0.000000e+00> : vector<16xf32>
    %40 = vector.multi_reduction <add>, %37, %cst_29 [0] : vector<15x16xf32> to vector<16xf32>
    %41 = vector.shape_cast %40 : vector<16xf32> to vector<1x16xf32>
    %cst_30 = arith.constant 6.250000e-02 : f32
    %42 = vector.broadcast %cst_30 : f32 to vector<1x16xf32>
    %43 = arith.mulf %41, %42 : vector<1x16xf32>
    %44 = arith.subf %39, %43 : vector<1x16xf32>
    %c0_31 = arith.constant 0 : index
    %c2 = arith.constant 2 : index
    %c0_32 = arith.constant 0 : index
    %45 = vector.load %arg3[%c0_31, %c2, %c0_32] : memref<1x4x16xf32, #tpu.memory_space<vmem>>, vector<1x1x16xf32>
    %46 = vector.shape_cast %45 : vector<1x1x16xf32> to vector<1x16xf32>
    %47 = vector.shape_cast %44 : vector<1x16xf32> to vector<1x1x16xf32>
    tpu.vector_store %arg3[%c0_31, %c2, %c0_32], %47 {strides = array<i32>} : memref<1x4x16xf32, #tpu.memory_space<vmem>>, vector<1x1x16xf32>,
    %c0_33 = arith.constant 0 : index
    %c0_34 = arith.constant 0 : index
    %c24 = arith.constant 24 : index
    %48 = vector.load %arg1[%c0_33, %c0_34, %c24] : memref<1x16x32xf32, #tpu.memory_space<vmem>>, vector<1x16x8xf32>
    %49 = vector.shape_cast %48 : vector<1x16x8xf32> to vector<16x8xf32>
    %c0_35 = arith.constant 0 : index
    %c0_36 = arith.constant 0 : index
    %c24_37 = arith.constant 24 : index
    %50 = vector.load %arg2[%c0_35, %c0_36, %c24_37] : memref<1x15x32xf32, #tpu.memory_space<vmem>>, vector<1x15x8xf32>
    %51 = vector.shape_cast %50 : vector<1x15x8xf32> to vector<15x8xf32>
    %52 = arith.mulf %51, %51 : vector<15x8xf32>
    %cst_38 = arith.constant dense<0.000000e+00> : vector<15x16xf32>
    %53 = tpu.matmul %52, %49, %cst_38 {dimension_numbers = #tpu.dot_dimension_numbers<[1], [1], [0], [0], [0, 0, 1, 0], [], []>} : vector<15x8xf32>, vector<16x8xf32>, vector<15x16xf32> -> vector<15x16xf32>
    %cst_39 = arith.constant dense<0xFF800000> : vector<16xf32>
    %54 = vector.multi_reduction <maximumf>, %53, %cst_39 [0] : vector<15x16xf32> to vector<16xf32>
    %55 = vector.shape_cast %54 : vector<16xf32> to vector<1x16xf32>
    %cst_40 = arith.constant dense<0.000000e+00> : vector<16xf32>
    %56 = vector.multi_reduction <add>, %53, %cst_40 [0] : vector<15x16xf32> to vector<16xf32>
    %57 = vector.shape_cast %56 : vector<16xf32> to vector<1x16xf32>
    %cst_41 = arith.constant 6.250000e-02 : f32
    %58 = vector.broadcast %cst_41 : f32 to vector<1x16xf32>
    %59 = arith.mulf %57, %58 : vector<1x16xf32>
    %60 = arith.subf %55, %59 : vector<1x16xf32>
    %c0_42 = arith.constant 0 : index
    %c3 = arith.constant 3 : index
    %c0_43 = arith.constant 0 : index
    %61 = vector.load %arg3[%c0_42, %c3, %c0_43] : memref<1x4x16xf32, #tpu.memory_space<vmem>>, vector<1x1x16xf32>
    %62 = vector.shape_cast %61 : vector<1x1x16xf32> to vector<1x16xf32>
    %63 = vector.shape_cast %60 : vector<1x16xf32> to vector<1x1x16xf32>
    tpu.vector_store %arg3[%c0_42, %c3, %c0_43], %63 {strides = array<i32>} : memref<1x4x16xf32, #tpu.memory_space<vmem>>, vector<1x1x16xf32>,
    return
  }
  func.func @transform_0(%arg0: i32) -> (i32, i32, i32) {
    %c0_i32 = arith.constant 0 : i32
    %c0_i32_0 = arith.constant 0 : i32
    %c0_i32_1 = arith.constant 0 : i32
    return %arg0, %c0_i32, %c0_i32_0 : i32, i32, i32
  }
  func.func @transform_1(%arg0: i32) -> (i32, i32, i32) {
    %c0_i32 = arith.constant 0 : i32
    %c0_i32_0 = arith.constant 0 : i32
    %c0_i32_1 = arith.constant 0 : i32
    return %arg0, %c0_i32, %c0_i32_0 : i32, i32, i32
  }
  func.func @transform_2(%arg0: i32) -> (i32, i32, i32) {
    %c0_i32 = arith.constant 0 : i32
    %c0_i32_0 = arith.constant 0 : i32
    %c0_i32_1 = arith.constant 0 : i32
    return %arg0, %c0_i32, %c0_i32_0 : i32, i32, i32
  }
}

</mosaic_0001>

<bundles_post_ra>
// kernel: tpu_custom_call.1
= control target key start
LH: loop header
LB: loop body
LE: loop exit
PB: predicated region body
PF: predicated region fallthrough
CT: control target
= control target key end

     0   :  { %7 = vsyncpa [#allocation3], 0  ;;  %s1084_s0 = inlined_call_operand.vmem [shape: f32[2,16,32], index: 0, kind: input, shape index: {}]   ;;  %s1085_s1 = inlined_call_operand.vmem [shape: f32[2,15,32], index: 1, kind: input, shape index: {}]   ;;  %s1086_s2 = inlined_call_operand.hbm [shape: f32[2,4,16], index: 2, kind: output, shape index: {}]  }
   0x1   :  { %9 = vsyncpa [#allocation3 + $0x1], 0  ;;  %s929_s9 = smov 0   ;;  %s931_s10 = smov 0  }
   0x2   :  { %s933_s11 = smov 0   ;;  %s935_s12 = smov 0  }
   0x3 LB: > { %s950_s13 = sadd.s32 4294967295, %s908_s12   ;;  %s731_s14 = sadd.s32 4294967294, %s908_s12   ;;  %s908_s12 = sphi %s935_s12, %s1092_s12   ;;  %s904_s11 = sphi %s933_s11, %s1091_s11   ;;  %s900_s10 = sphi %s931_s10, %s1090_s10   ;;  %s896_s9 = sphi %s929_s9, %s1089_s9  }
   0x4   : > { %s954_s15 = sadd.s32 1, %s908_s12   ;;  %s74_s16 = sadd.s32 1, %s904_s11 }
   0x5   : > { %s71_s17 = ssub.s32 %s908_s12, %s954_s15  ;;  %p84_p0 = scmp.ne.s32.totalorder %s904_s11, %s900_s10 }
   0x6   : > { %p72_p1 = scmp.eq.s32.totalorder %s71_s17, 0  ;;  %p85_p2 = scmp.eq.s32.totalorder %s950_s13, 1 }
   0x7   : > { %p90_p3 = scmp.ne.s32.totalorder %s900_s10, %s896_s9  ;;  %p91_p4 = scmp.eq.s32.totalorder %s731_s14, 1 }
   0x8   : > { %s965_s18 = scalar_select %p72_p1, %s904_s11, %s74_s16  }
   0x9   : > { %p967_p5 = por %p85_p2, %p84_p0  ;;  %p971_p6 = por %p91_p4, %p90_p3 }
   0xa   : > { %p734_p7 = scmp.ge.s32.totalorder %s908_s12, 1  ;;  %p125_p8 = scmp.lt.s32.totalorder %s908_s12, 3 }
   0xc   : > { %p126_p9 = pnand %p734_p7, %p125_p8 }
   0xd   : > { %p152_p10 = scmp.lt.s32.totalorder (!%p126_p9), %s950_s13, 1  ;;  %s910_s29 = smov (!%p126_p9), 112  }
   0xe   : > { %129 = sbr.rel (%p126_p9) target bundleno = 387 (0x183), region = 28  ;;  %s911_s30 = smov (!%p126_p9), 120  }
   0xf   : > { %s912_s3 = smov (!%p126_p9), 104   ;;  %s149_s4 = sand.u32 (!%p126_p9), 1, %s900_s10  }
  0x10   : > { %s735_s5 = sshll.u32 (!%p126_p9), %s149_s4, 2  ;;  %s757_s7 = sshll.u32 (!%p126_p9), %s950_s13, 6 }
  0x11   : > { %s1020_s6 = scalar_lea.vmem (!%p126_p9), [#allocation2], %s735_s5  ;;  %s1043_s17 = scalar_lea.hbm (!%p126_p9), %s1086_s2, %s757_s7 }
  0x12   : > { %s660_s8 = sshll.u32 (!%p126_p9), %s1020_s6, 4  ;;  %s661_s8 = int_to_ptr.vmem [resolvable:$true] %s660_s8 }
  0x13   : > { %s153_s21 = scalar_select %p152_p10, %s950_s13, 1  ;;  %vm168_vm0 = vcmask 64512   ;;  %vm258_vm1 = vcmask 129024   ;;  %vm256_vm2 = vcmask 130048   ;;  %vm278_vm3 = vcmask 122880  }
  0x14   : > { %s913_s13 = smov [#allocation2]  }
  0x15   : > { %s760_s22 = sshll.u32 %s153_s21, 4  ;;  %s647_s21 = scalar_lea.sflag [#allocation3], %s149_s4 }
  0x16   : > { %s156_s25 = scalar_lea.vmem %s1084_s0, %s760_s22  ;;  %s161_s28 = scalar_lea.vmem %s1085_s1, %s760_s22 }
  0x17   : > { %v403_v0 = vld [vmem:[%s156_s25 + $0x8] sm:$0xff]  ;;  %v282_v1 = vld [vmem:[%s161_s28] sm:$0xff]  ;;  %s848_s22 = scalar_lea.vmem %s661_s8, 64  ;;  %s852_s23 = sshll.u32 %s913_s13, 4  ;;  %s853_s23 = int_to_ptr.vmem [resolvable:$false] %s852_s23 }
  0x18   : > { %418 = vrot.lane.b32.xlu1 %v403_v0, %s910_s29  ;;  %296 = vrot.lane.b32.xlu0 %v403_v0, %s911_s30  ;;  %v284_v2 = vmul.f32 %v282_v1, %v282_v1  ;;  %v280_v3 = vld [vmem:[%s156_s25] sm:$0xff]  ;;  %v283_v4 = vld [vmem:[%s161_s28 + $0x8] sm:$0x7f]  ;;  %p849_p11 = scmp.ne.s32.totalorder %s661_s8, %s848_s22  ;;  %s854_s24 = scalar_lea.vmem %s853_s23, 128 }
  0x19   : > { %778 = vmatprep.subr.msk.mxu0 %vm168_vm0, %v403_v0  ;;  %v165_v5 = vld [vmem:[%s161_s28 + $0x8] sm:$0x7f]  ;;  %v285_v6 = vmul.f32 %v283_v4, %v283_v4  ;;  %p855_p0 = scmp.lt.s32.totalorder %s661_s8, %s853_s23  ;;  %p856_p1 = scmp.lt.s32.totalorder %s854_s24, %s848_s22 }
  0x1a   : > { %779 = vmatpush3.xpose.msk.msra.mxu0 %vm168_vm0, %v403_v0  ;;  %782 = vmatprep.mubr.msk.f32.mxu0 %vm168_vm0, %v284_v2  ;;  %v167_v7 = vmul.f32 %v165_v5, %v165_v5  ;;  %v527_v8 = vld [vmem:[%s161_s28 + $0x8] sm:$0x7f]  ;;  %p850_p12 = pnand %p849_p11, %p967_p5 }
  0x1b   : > { %780 = vmatprep.subr.msk.mxu0 %vm168_vm0, %v280_v3  ;;  %v405_v9 = vld [vmem:[%s161_s28 + $0x8] sm:$0x7f]  ;;  %v529_v10 = vmul.f32 %v527_v8, %v527_v8  ;;  %p857_p2 = por %p856_p1, %p855_p0 }
  0x1c   : > { %288 = vrot.lane.b32.xlu1 %v284_v2, %s911_s30  ;;  %294 = vrot.lane.b32.xlu0 %v280_v3, %s911_s30  ;;  %v407_v11 = vmul.f32 %v405_v9, %v405_v9  ;;  %p851_p13 = pneg %p850_p12 }
  0x1e   : > { %781 = vmatpush3.xpose.msk.msra.mxu0 %vm168_vm0, %v280_v3  ;;  %p858_p3 = pnand %p857_p2, %p851_p13 }
  0x20   : > { %290 = vrot.lane.b32.xlu1 %v285_v6, %s911_s30  ;;  %540 = vrot.lane.b32.xlu0 %v403_v0, %s912_s3 }
  0x21   : > { %783 = vmatmul.mubr.msk.f32.vlgmr.msra.gmra.mxu0 %vm168_vm0, %v167_v7 }
  0x24   : > { %538 = vrot.lane.b32.xlu1 %v280_v3, %s912_s3  ;;  %416 = vrot.lane.b32.xlu0 %v280_v3, %s910_s29 }
  0x28   : > { %532 = vrot.lane.b32.xlu1 %v284_v2, %s912_s3  ;;  %410 = vrot.lane.b32.xlu0 %v284_v2, %s910_s29 }
  0x2c   : > { %534 = vrot.lane.b32.xlu1 %v529_v10, %s912_s3  ;;  %412 = vrot.lane.b32.xlu0 %v407_v11, %s910_s29 }
  0x8a   : > { %v419_v12 = vpop.permute.xlu1 %418  ;;  %v297_v13 = vpop.permute.xlu0 %296 }
  0x8b   : > { %785 = vmatprep.subr.msk.mxu1 %vm168_vm0, %v297_v13  ;;  %792 = vmatprep.subr.msk.mxu0 %vm168_vm0, %v419_v12 }
  0x8c   : > { %786 = vmatpush3.xpose.msk.msra.mxu1 %vm168_vm0, %v297_v13  ;;  %793 = vmatpush3.xpose.msk.msra.mxu0 %vm168_vm0, %v419_v12 }
  0x8e   : > { %v289_v14 = vpop.permute.xlu1 %288  ;;  %v295_v15 = vpop.permute.xlu0 %294 }
  0x8f   : > { %787 = vmatprep.subr.msk.mxu1 %vm168_vm0, %v295_v15  ;;  %789 = vmatprep.mubr.msk.f32.mxu1 %vm168_vm0, %v289_v14 }
  0x90   : > { %788 = vmatpush3.xpose.msk.msra.mxu1 %vm168_vm0, %v295_v15 }
  0x92   : > { %v291_v16 = vpop.permute.xlu1 %290  ;;  %v541_v17 = vpop.permute.xlu0 %540 }
  0x93   : > { %790 = vmatmul.mubr.msk.f32.vlgmr.msra.gmra.mxu1 %vm168_vm0, %v291_v16  ;;  %799 = vmatprep.subr.msk.mxu1 %vm168_vm0, %v541_v17 }
  0x94   : > { %800 = vmatpush3.xpose.msk.msra.mxu1 %vm168_vm0, %v541_v17 }
  0x96   : > { %v539_v18 = vpop.permute.xlu1 %538  ;;  %v417_v19 = vpop.permute.xlu0 %416 }
  0x97   : > { %794 = vmatprep.subr.msk.mxu0 %vm168_vm0, %v417_v19  ;;  %801 = vmatprep.subr.msk.mxu1 %vm168_vm0, %v539_v18 }
  0x98   : > { %795 = vmatpush3.xpose.msk.msra.mxu0 %vm168_vm0, %v417_v19  ;;  %802 = vmatpush3.xpose.msk.msra.mxu1 %vm168_vm0, %v539_v18 }
  0x9a   : > { %v533_v20 = vpop.permute.xlu1 %532  ;;  %v411_v21 = vpop.permute.xlu0 %410 }
  0x9b   : > { %796 = vmatprep.mubr.msk.f32.mxu0 %vm168_vm0, %v411_v21  ;;  %803 = vmatprep.mubr.msk.f32.mxu1 %vm168_vm0, %v533_v20 }
  0x9e   : > { %v535_v22 = vpop.permute.xlu1 %534  ;;  %v413_v23 = vpop.permute.xlu0 %412 }
  0x9f   : > { %797 = vmatmul.mubr.msk.f32.vlgmr.msra.gmra.mxu0 %vm168_vm0, %v413_v23  ;;  %804 = vmatmul.mubr.msk.f32.vlgmr.msra.gmra.mxu1 %vm168_vm0, %v535_v22 }
  0xe1   : > { %v784_v24 = vpop.f32.mrf.mxu0 }
  0xe2   : > { %v259_v25 = vsel %vm258_vm1, %v784_v24, -inf  ;;  %v268_v26 = vsel %vm258_vm1, %v784_v24, 0.0 }
  0xe3   : > { %v247_v27 = vpop.f32.mrf.mxu0 }
  0xe4   : > { %v257_v28 = vsel %vm256_vm2, %v247_v27, -inf  ;;  %v267_v29 = vsel %vm256_vm2, %v247_v27, 0.0 }
  0xe5   : > { %v260_v30 = vmax.f32 %v257_v28, %v259_v25  ;;  %v269_v31 = vadd.f32 %v268_v26, %v267_v29 }
  0xe7   : > { %v261_v32 = vrot.slane %v260_v30, 4  ;;  %v270_v33 = vrot.slane %v269_v31, 4 }
  0xe9   : > { %v262_v34 = vmax.f32 %v260_v30, %v261_v32  ;;  %v271_v35 = vadd.f32 %v270_v33, %v269_v31 }
  0xeb   : > { %v263_v36 = vrot.slane %v262_v34, 2  ;;  %v272_v37 = vrot.slane %v271_v35, 2 }
  0xed   : > { %v264_v38 = vmax.f32 %v262_v34, %v263_v36  ;;  %v273_v39 = vadd.f32 %v272_v37, %v271_v35 }
  0xef   : > { %v265_v40 = vrot.slane %v264_v38, 1  ;;  %v274_v41 = vrot.slane %v273_v39, 1 }
  0xf1   : > { %v266_v42 = vmax.f32 %v264_v38, %v265_v40  ;;  %v275_v43 = vadd.f32 %v274_v41, %v273_v39 }
  0xf3   : > { %v276_v44 = vmul.f32 0.0625, %v275_v43 }
  0xf5   : > { %v277_v45 = vsub.f32 %v266_v42, %v276_v44 }
  0xf7   : > { %279 = vst.msk [vmem:[%s1020_s6] sm:$0x1] %vm278_vm3, %v277_v45 }
 0x153   : > { %v791_v46 = vpop.f32.mrf.mxu1 }
 0x154   : > { %v382_v48 = vsel %vm258_vm1, %v791_v46, -inf  ;;  %v391_v49 = vsel %vm258_vm1, %v791_v46, 0.0 }
 0x155   : > { %v372_v47 = vpop.f32.mrf.mxu1 }
 0x156   : > { %v381_v50 = vsel %vm256_vm2, %v372_v47, -inf  ;;  %v390_v51 = vsel %vm256_vm2, %v372_v47, 0.0 }
 0x157   : > { %v383_v52 = vmax.f32 %v381_v50, %v382_v48  ;;  %v392_v53 = vadd.f32 %v391_v49, %v390_v51 }
 0x159   : > { %v384_v54 = vrot.slane %v383_v52, 4  ;;  %v393_v55 = vrot.slane %v392_v53, 4 }
 0x15b   : > { %v385_v56 = vmax.f32 %v383_v52, %v384_v54  ;;  %v394_v57 = vadd.f32 %v393_v55, %v392_v53 }
 0x15d   : > { %v386_v58 = vrot.slane %v385_v56, 2  ;;  %v395_v59 = vrot.slane %v394_v57, 2 }
 0x15f   : > { %v387_v60 = vmax.f32 %v385_v56, %v386_v58  ;;  %v396_v61 = vadd.f32 %v395_v59, %v394_v57  ;;  %v798_v62 = vpop.f32.mrf.mxu0  ;;  %v805_v63 = vpop.f32.mrf.mxu1 }
 0x160   : > { %v504_v0 = vsel %vm258_vm1, %v798_v62, -inf  ;;  %v513_v3 = vsel %vm258_vm1, %v798_v62, 0.0  ;;  %v626_v4 = vsel %vm258_vm1, %v805_v63, -inf  ;;  %v635_v12 = vsel %vm258_vm1, %v805_v63, 0.0 }
 0x161   : > { %v388_v1 = vrot.slane %v387_v60, 1  ;;  %v397_v2 = vrot.slane %v396_v61, 1  ;;  %v494_v5 = vpop.f32.mrf.mxu0  ;;  %v616_v6 = vpop.f32.mrf.mxu1 }
 0x162   : > { %v503_v7 = vsel %vm256_vm2, %v494_v5, -inf  ;;  %v512_v8 = vsel %vm256_vm2, %v494_v5, 0.0  ;;  %v625_v9 = vsel %vm256_vm2, %v616_v6, -inf  ;;  %v634_v10 = vsel %vm256_vm2, %v616_v6, 0.0 }
 0x163   : > { %v398_v11 = vadd.f32 %v397_v2, %v396_v61  ;;  %v505_v13 = vmax.f32 %v503_v7, %v504_v0  ;;  %v514_v14 = vadd.f32 %v513_v3, %v512_v8  ;;  %v627_v15 = vmax.f32 %v625_v9, %v626_v4 }
 0x164   : > { %v636_v16 = vadd.f32 %v635_v12, %v634_v10  ;;  %v389_v17 = vmax.f32 %v387_v60, %v388_v1 }
 0x165   : > { %v399_v18 = vmul.f32 0.0625, %v398_v11  ;;  %v506_v19 = vrot.slane %v505_v13, 4  ;;  %v515_v20 = vrot.slane %v514_v14, 4  ;;  %v628_v21 = vrot.slane %v627_v15, 4 }
 0x166   : > { %v637_v22 = vrot.slane %v636_v16, 4 }
 0x167   : > { %v400_v23 = vsub.f32 %v389_v17, %v399_v18  ;;  %v507_v24 = vmax.f32 %v505_v13, %v506_v19  ;;  %v516_v25 = vadd.f32 %v515_v20, %v514_v14  ;;  %v629_v26 = vmax.f32 %v627_v15, %v628_v21 }
 0x168   : > { %v638_v27 = vadd.f32 %v637_v22, %v636_v16 }
 0x169   : > { %v508_v28 = vrot.slane %v507_v24, 2  ;;  %v517_v29 = vrot.slane %v516_v25, 2  ;;  %401 = vst.msk [vmem:[%s1020_s6 + $0x1] sm:$0x1] %vm278_vm3, %v400_v23  ;;  %v630_v30 = vrot.slane %v629_v26, 2 }
 0x16a   : > { %v639_v31 = vrot.slane %v638_v27, 2 }
 0x16b   : > { %v509_v32 = vmax.f32 %v507_v24, %v508_v28  ;;  %v518_v33 = vadd.f32 %v517_v29, %v516_v25  ;;  %v631_v34 = vmax.f32 %v629_v26, %v630_v30 }
 0x16c   : > { %v640_v35 = vadd.f32 %v639_v31, %v638_v27 }
 0x16d   : > { %v510_v36 = vrot.slane %v509_v32, 1  ;;  %v519_v37 = vrot.slane %v518_v33, 1  ;;  %v632_v38 = vrot.slane %v631_v34, 1 }
 0x16e   : > { %v641_v39 = vrot.slane %v640_v35, 1 }
 0x16f   : > { %v520_v40 = vadd.f32 %v519_v37, %v518_v33  ;;  %v511_v42 = vmax.f32 %v509_v32, %v510_v36  ;;  %v633_v44 = vmax.f32 %v631_v34, %v632_v38 }
 0x170   : > { %v642_v41 = vadd.f32 %v641_v39, %v640_v35 }
 0x171   : > { %v521_v43 = vmul.f32 0.0625, %v520_v40 }
 0x172   : > { %v643_v45 = vmul.f32 0.0625, %v642_v41 }
 0x173   : > { %v522_v46 = vsub.f32 %v511_v42, %v521_v43 }
 0x174   : > { %v644_v47 = vsub.f32 %v633_v44, %v643_v45 }
 0x175   : > { %523 = vst.msk [vmem:[%s1020_s6 + $0x2] sm:$0x1] %vm278_vm3, %v522_v46 }
 0x176   : > { %645 = vst.msk [vmem:[%s1020_s6 + $0x3] sm:$0x1] %vm278_vm3, %v644_v47 }
 0x177   : > { %861 = shalt.err (!%p858_p3)
}
 0x178   : > { %s862_s25 = scalar_lea.hbm %s1043_s17, 64  ;;  %s866_s28 = scalar_lea.hbm %s1086_s2, 128 }
 0x179   : > { %p863_p4 = scmp.ne.s32.totalorder %s1043_s17, %s862_s25  ;;  %p867_p9 = scmp.lt.s32.totalorder %s1043_s17, %s1086_s2 }
 0x17a   : > { %p868_p10 = scmp.lt.s32.totalorder %s866_s28, %s862_s25 }
 0x17b   : > { %p864_p7 = pnand %p863_p4, %p967_p5 }
 0x17c   : > { %p869_p11 = por %p868_p10, %p867_p9 }
 0x17d   : > { %p865_p8 = pneg %p864_p7 }
 0x17f   : > { %p870_p12 = pnand %p869_p11, %p865_p8 }
 0x181   : > { %873 = shalt.err (!%p870_p12)
}
 0x182   : > { %806 = dma.vmem_to_hbm [thread:$0]  (%p967_p5), %s661_s8, 64, %s1043_s17, %s647_s21  }
 0x183 PF: > { %p812_p13 = scmp.ge.s32.totalorder %s908_s12, 2  ;;  %s672_s3 = sand.u32 1, %s896_s9  }
 0x184   : > { %s673_s4 = scalar_lea.sflag [#allocation3], %s672_s3 }
 0x185   : > { %p809_p0 = pnand %p812_p13, %p971_p6 }
 0x187   : > { %p810_p1 = pneg %p809_p0 }
 0x189   : > { %891 = dma.done.wait (%p810_p1), %s673_s4, 64  }
 0x18a   : > { %893 = vsyncadd (%p810_p1), %s673_s4, 4294967232  ;;  %p12_p2 = scmp.ge.s32.totalorder %s954_s15, 4   ;;  %s1089_s9 = smov %s900_s10 }
 0x18b   : > { %s1090_s10 = smov %s904_s11  ;;  %s1091_s11 = smov %s965_s18 }
 0x18c   : > { %s1092_s12 = smov %s954_s15  ;;  %14 = sbr.rel (!%p12_p2) target bundleno = 3 (0x3), region = 66 }
 0x191   :  { %678 = vsyncpa [#allocation3], 1 }
 0x192   :  { %680 = vsyncpa [#allocation3 + $0x1], 1 }

</bundles_post_ra>
